<compile_context>
chip_gen: v5e
topology: v5e:2x2
jax: 0.10.0
libtpu: 0.0.40
codegen_flags: <defaults>
</compile_context>

<pallas_src>
import jax
import jax.numpy as jnp
from jax.experimental import pallas as pl
from jax.experimental.pallas import tpu as pltpu

LEAKY_SLOPE = 0.01      # torch.nn.LeakyReLU default negative_slope
LANE = 128
SUB = 8
MAX_TM = 512            # dst-node tile (sublane axis of the aggregation matmul)
MAX_TK = 1024           # src-node tile (reduction axis)


def _round_up(x, m):
    return ((x + m - 1) // m) * m


def _pad_and_tile(n, max_tile):
    """(padded_n, tile) with tile | padded_n and tile legal for the (8,128) rules."""
    n8 = _round_up(n, SUB)
    if n8 <= max_tile:
        return n8, n8
    return _round_up(n, max_tile), max_tile


def _dst_pad_and_tile(n, max_tile):
    """Like _pad_and_tile but guarantees >= 2 dst tiles whenever possible so the
    'parallel' dst grid axis can be sharded across both TensorCores on v7x."""
    n8 = _round_up(n, SUB)
    if n8 <= max_tile:
        if n8 >= 2 * SUB:
            half = _round_up((n8 + 1) // 2, SUB)
            return 2 * half, half
        return n8, n8
    return _round_up(n, max_tile), max_tile


def _vmem_limit(vmem_est):
    """Generation-aware VMEM request: never ask for more than 75% of physical VMEM."""
    try:
        cap = int(pltpu.get_tpu_info().vmem_capacity_bytes)
    except Exception:
        cap = 64 * 1024 * 1024            # conservative fallback: v7x per-TC physical
    return int(min(int(0.75 * cap), max(32 * 1024 * 1024, 4 * int(vmem_est))))


# ----------------------------------------------------------------------------
# Kernel 1 (tiny, runs once per stage): per-rating message Linear
#   msg_r = X @ W_r + b_r          -> bf16 [n_r, n_src_pad, seg]
# ----------------------------------------------------------------------------
def _message_kernel(x_ref, w_ref, b_ref, o_ref):
    o_ref[...] = (jnp.dot(x_ref[...], w_ref[...], preferred_element_type=jnp.float32)
                  + b_ref[...]).astype(o_ref.dtype)


def _precompute_messages(x_src, w_stack, b_stack, n_src_pad, tk, seg):
    n_r, d_in, emb = w_stack.shape
    d_in_pad = _round_up(d_in, LANE)      # full-lane K: unmasked loads, aligned MXU feed
    x = jnp.pad(x_src.astype(jnp.float32),
                ((0, n_src_pad - x_src.shape[0]),
                 (0, d_in_pad - d_in))).astype(jnp.bfloat16)
    w = jnp.pad(w_stack, ((0, 0), (0, d_in_pad - d_in),
                          (0, seg - emb))).astype(jnp.bfloat16)
    b = jnp.pad(b_stack, ((0, 0), (0, seg - emb))).reshape(n_r, 1, seg).astype(jnp.float32)
    n_k = n_src_pad // tk
    return pl.pallas_call(
        _message_kernel,
        out_shape=jax.ShapeDtypeStruct((n_r, n_src_pad, seg), jnp.bfloat16),
        grid=(n_r, n_k),
        in_specs=[
            pl.BlockSpec((tk, d_in_pad), lambda r, k: (k, 0)),          # X
            pl.BlockSpec((None, d_in_pad, seg), lambda r, k: (r, 0, 0)),  # W_r
            pl.BlockSpec((None, 1, seg), lambda r, k: (r, 0, 0)),       # b_r
        ],
        out_specs=pl.BlockSpec((None, tk, seg), lambda r, k: (r, k, 0)),
        compiler_params=pltpu.CompilerParams(
            dimension_semantics=("parallel", "parallel")),
    )(x, w, b)


# ----------------------------------------------------------------------------
# Kernel 2 (fused): mean aggregation over the row-normalized adjacency
#                   + streaming aggregate Linear + LeakyReLU epilogue
# ----------------------------------------------------------------------------
def _fused_aggregate_kernel(adj_ref, msg_ref, feat_ref, waggf_ref, waggr_ref, bagg_ref,
                            o_ref, acc_r_ref, acc_out_ref):
    r = pl.program_id(1)          # rating index
    k = pl.program_id(2)          # src-node tile index (reduction)
    nr = pl.num_programs(1)
    nk = pl.num_programs(2)

    # --- init per dst tile: dst-feature contribution of the aggregate Linear + bias --
    @pl.when((r == 0) & (k == 0))
    def _init_out():
        acc_out_ref[...] = (jnp.dot(feat_ref[...], waggf_ref[...],
                                    preferred_element_type=jnp.float32)
                            + bagg_ref[...])

    # --- mean aggregation: h_r(tile) += A_r(tile) @ msg_r(tile)  (single MXU matmul) --
    part = jnp.dot(adj_ref[...], msg_ref[...], preferred_element_type=jnp.float32)

    @pl.when(k == 0)
    def _first_k():
        acc_r_ref[...] = part

    @pl.when(k > 0)
    def _accum_k():
        acc_r_ref[...] += part

    # --- fold this rating's segment into the aggregate Linear output accumulator -----
    @pl.when(k == nk - 1)
    def _fold_rating():
        acc_out_ref[...] += jnp.dot(acc_r_ref[...].astype(jnp.bfloat16), waggr_ref[...],
                                    preferred_element_type=jnp.float32)

    # --- epilogue: LeakyReLU, single full-lane store of the output tile --------------
    @pl.when((r == nr - 1) & (k == nk - 1))
    def _epilogue():
        acc = acc_out_ref[...]
        o_ref[...] = jnp.where(acc >= 0.0, acc, LEAKY_SLOPE * acc).astype(o_ref.dtype)


def prepare_adj_stack(adj_dict, rating_set, n_dst, n_src):
    """Stack + pad + bf16-cast the row-normalized adjacency ONCE at graph-construction
    time so the forward path streams it directly (no extra padded HBM copy)."""
    n_dst_pad, _ = _dst_pad_and_tile(n_dst, MAX_TM)
    n_src_pad, _ = _pad_and_tile(n_src, MAX_TK)
    a = jnp.stack([adj_dict[r] for r in rating_set], axis=0).astype(jnp.float32)
    return jnp.pad(a, ((0, 0), (0, n_dst_pad - n_dst),
                       (0, n_src_pad - n_src))).astype(jnp.bfloat16)


def fused_propagate(adj_stack, x_src, w_stack, b_stack, dst_feat, w_agg, b_agg):
    """One GCMC propagation stage.

    adj_stack : row-normalized adjacency per rating; preferably pre-padded bf16
                (prepare_adj_stack), else raw f32 [n_r, n_dst, n_src]
    x_src     : [n_src, d_in]         source-node message inputs
    w_stack   : [n_r, d_in, emb]      per-rating message Linear weights ([in, out])
    b_stack   : [n_r, emb]            per-rating message Linear biases
    dst_feat  : [n_dst, d_feat]       destination-node features
    w_agg     : [d_feat + n_r*emb, emb]  aggregate Linear weight ([in, out])
    b_agg     : [emb]
    returns   : [n_dst, emb] f32 = LeakyReLU(aggregate Linear(concat(feat, h_1..h_R)))
    """
    n_r, d_in, emb = w_stack.shape
    n_src = x_src.shape[0]
    n_dst, d_feat = dst_feat.shape
    assert w_agg.shape[0] == d_feat + n_r * emb

    seg = _round_up(max(emb, d_feat), LANE)    # lane-dense message / feature width
    n_out = _round_up(emb, LANE)               # lane-dense output width

    n_dst_pad, tm = _dst_pad_and_tile(n_dst, MAX_TM)
    n_src_pad, tk = _pad_and_tile(n_src, MAX_TK)

    # Adjacency: use the pre-padded bf16 stack directly when it matches (no extra copy).
    if adj_stack.shape == (n_r, n_dst_pad, n_src_pad) and adj_stack.dtype == jnp.bfloat16:
        adj = adj_stack
    else:  # fallback path; costs one extra pad+cast round trip over the adjacency
        adj = jnp.pad(adj_stack.astype(jnp.float32),
                      ((0, 0), (0, n_dst_pad - adj_stack.shape[1]),
                       (0, n_src_pad - adj_stack.shape[2]))).astype(jnp.bfloat16)

    # Hoisted per-rating message Linear (separate tiny pallas_call, run once).
    msg = _precompute_messages(x_src, w_stack, b_stack, n_src_pad, tk, seg)

    feat = jnp.pad(dst_feat.astype(jnp.float32),
                   ((0, n_dst_pad - n_dst), (0, seg - d_feat))).astype(jnp.bfloat16)

    # Aggregate Linear weight split into the dst-feature slice + one slice per rating
    # (each fed by its own BlockSpec -> no dynamic ref indexing in the kernel).
    wagg_feat = jnp.zeros((seg, n_out), jnp.float32).at[:d_feat, :emb].set(w_agg[:d_feat])
    wagg_feat = wagg_feat.astype(jnp.bfloat16)
    wagg_rate = jnp.zeros((n_r, seg, n_out), jnp.float32)
    for r in range(n_r):
        wagg_rate = wagg_rate.at[r, :emb, :emb].set(
            w_agg[d_feat + r * emb: d_feat + (r + 1) * emb])
    wagg_rate = wagg_rate.astype(jnp.bfloat16)
    bagg = jnp.zeros((1, n_out), jnp.float32).at[0, :emb].set(b_agg)

    n_i = n_dst_pad // tm
    n_k = n_src_pad // tk
    grid = (n_i, n_r, n_k)

    # VMEM budget: double-buffered blocks + the two persistent accumulators.
    block_bytes = (tm * tk * 2 + tk * seg * 2 + tm * seg * 2
                   + seg * n_out * 2 + seg * n_out * 2 + n_out * 4 + tm * n_out * 4)
    vmem_est = 2 * block_bytes + tm * seg * 4 + tm * n_out * 4

    flops = (2 * n_r * n_dst_pad * n_src_pad * seg          # aggregation matmuls
             + 2 * (n_r + 1) * n_dst_pad * seg * n_out)     # streaming aggregate Linear
    bytes_accessed = (adj.size * 2 + msg.size * 2 * n_i + feat.size * 2
                      + wagg_feat.size * 2 + wagg_rate.size * 2 + bagg.size * 4
                      + n_dst_pad * n_out * 4)

    out = pl.pallas_call(
        _fused_aggregate_kernel,
        out_shape=jax.ShapeDtypeStruct((n_dst_pad, n_out), jnp.float32),
        grid_spec=pltpu.PrefetchScalarGridSpec(
            num_scalar_prefetch=0,
            grid=grid,
            in_specs=[
                pl.BlockSpec((None, tm, tk), lambda i, r, k: (r, i, k)),      # adjacency
                pl.BlockSpec((None, tk, seg), lambda i, r, k: (r, k, 0)),     # messages
                pl.BlockSpec((tm, seg), lambda i, r, k: (i, 0)),              # dst features
                pl.BlockSpec((seg, n_out), lambda i, r, k: (0, 0)),           # W_agg (feat)
                pl.BlockSpec((None, seg, n_out), lambda i, r, k: (r, 0, 0)),  # W_agg (rating r)
                pl.BlockSpec((1, n_out), lambda i, r, k: (0, 0)),             # b_agg
            ],
            out_specs=pl.BlockSpec((tm, n_out), lambda i, r, k: (i, 0)),
            scratch_shapes=[pltpu.VMEM((tm, seg), jnp.float32),     # per-rating accumulator
                            pltpu.VMEM((tm, n_out), jnp.float32)],  # output accumulator
        ),
        compiler_params=pltpu.CompilerParams(
            dimension_semantics=("parallel", "arbitrary", "arbitrary"),
            vmem_limit_bytes=_vmem_limit(vmem_est),
        ),
        cost_estimate=pl.CostEstimate(flops=int(flops), transcendentals=0,
                                      bytes_accessed=int(bytes_accessed)),
    )(adj, msg, feat, wagg_feat, wagg_rate, bagg)

    # TODO(synk): when this output feeds the next stage, a bf16 padded handoff would
    # save the slice + re-pad round trip; kept f32 / sliced for a clean public API.
    return out[:n_dst, :emb]


# ----------------------------------------------------------------------------
# Parameter initialization (deterministic, synthetic; matches module shapes)
# ----------------------------------------------------------------------------
def _xavier_uniform(key, out_dim, in_dim):
    # torch nn.Linear weight is [out, in]; stored transposed as [in, out] so the
    # kernels compute x @ W directly (identical math).
    limit = (6.0 / (in_dim + out_dim)) ** 0.5
    w = jax.random.uniform(key, (out_dim, in_dim), jnp.float32, -limit, limit)
    return jnp.transpose(w)


def init_params(key, rating_set, n_items, emb, user_feat_dim, item_feat_dim):
    n_r = len(rating_set)
    keys = jax.random.split(key, 6 + 4 * n_r)
    params = {}
    params["item_id_embedding"] = _xavier_uniform(keys[0], n_items, emb).T  # [n_items, emb]
    params["W"] = {}
    params["W_rev"] = {}
    for i, r in enumerate(rating_set):
        kw, kb, krw, krb = keys[6 + 4 * i: 10 + 4 * i]
        params["W"][r] = (
            _xavier_uniform(kw, emb, emb),                                   # [emb, emb]
            jax.random.uniform(kb, (emb,), jnp.float32, -0.05, 0.05),
        )
        params["W_rev"][r] = (
            _xavier_uniform(krw, emb, emb + item_feat_dim),                  # [emb+feat, emb]
            jax.random.uniform(krb, (emb,), jnp.float32, -0.05, 0.05),
        )
    params["item_agg"] = (
        _xavier_uniform(keys[1], emb, emb * n_r + item_feat_dim),
        jax.random.uniform(keys[2], (emb,), jnp.float32, -0.05, 0.05),
    )
    params["user_agg"] = (
        _xavier_uniform(keys[3], emb, emb * n_r + user_feat_dim),
        jax.random.uniform(keys[4], (emb,), jnp.float32, -0.05, 0.05),
    )
    return params


# ----------------------------------------------------------------------------
# Forward pass (glue in plain JAX, heavy lifting in the Pallas kernels)
# ----------------------------------------------------------------------------
def propagate_item_to_user(params, rating_set, block0):
    """block0: item(src) -> user(dst)."""
    item_nids = block0["src_item_nids"]
    item_feat = block0["src_item_features"]
    user_feat = block0["dst_user_features"]

    # TODO(synk): the item-ID embedding gather + concat stays in XLA; folding it into
    # the message kernel would need a scalar-prefetch row gather (pl.Element index_map).
    item_id_emb = jnp.take(params["item_id_embedding"], item_nids, axis=0)
    msg_input = jnp.concatenate([item_feat, item_id_emb], axis=1)

    adj_stack = block0.get("adj_rev_prepared")
    if adj_stack is None:
        adj_stack = jnp.stack([block0["adj_rev"][r] for r in rating_set], axis=0)
    w_stack = jnp.stack([params["W_rev"][r][0] for r in rating_set], axis=0)
    b_stack = jnp.stack([params["W_rev"][r][1] for r in rating_set], axis=0)
    w_agg, b_agg = params["user_agg"]
    return fused_propagate(adj_stack, msg_input, w_stack, b_stack, user_feat, w_agg, b_agg)


def propagate_user_to_item(params, rating_set, user_h, block1):
    """block1: user(src, carries h) -> item(dst)."""
    item_feat = block1["dst_item_features"]
    adj_stack = block1.get("adj_prepared")
    if adj_stack is None:
        adj_stack = jnp.stack([block1["adj"][r] for r in rating_set], axis=0)
    w_stack = jnp.stack([params["W"][r][0] for r in rating_set], axis=0)
    b_stack = jnp.stack([params["W"][r][1] for r in rating_set], axis=0)
    w_agg, b_agg = params["item_agg"]
    return fused_propagate(adj_stack, user_h, w_stack, b_stack, item_feat, w_agg, b_agg)


def gcmc_encoder_forward(params, rating_set, blocks, dst_node_type, user_h=None):
    if dst_node_type == "user":
        assert len(blocks) == 1
        user_emb = propagate_item_to_user(params, rating_set, blocks[0]) if user_h is None else user_h
        nids = [int(n) for n in blocks[-1]["dst_user_nids"]]
        return user_emb, {nid: idx for idx, nid in enumerate(nids)}
    elif dst_node_type == "item":
        assert len(blocks) == 2
        if user_h is None:  # optionally reuse a precomputed item->user propagation
            user_h = propagate_item_to_user(params, rating_set, blocks[0])
        item_emb = propagate_user_to_item(params, rating_set, user_h, blocks[1])
        nids = [int(n) for n in blocks[-1]["dst_item_nids"]]
        return item_emb, {nid: idx for idx, nid in enumerate(nids)}
    else:
        raise ValueError()


# ----------------------------------------------------------------------------
# Synthetic graph construction + pure-JAX reference for a tolerance check
# ----------------------------------------------------------------------------
def _random_norm_adj(key, n_dst, n_src, p=0.4):
    """Random bipartite adjacency, row-normalized (mean aggregation). Zero-degree rows
    stay all-zero, matching the th.zeros fallback in the reference module."""
    # TODO(synk): real GCMC graphs are sparse; a CSR / scalar-prefetch aggregation would
    # avoid streaming dense zero adjacency tiles, but is out of scope here.
    a = jax.random.bernoulli(key, p, (n_dst, n_src)).astype(jnp.float32)
    deg = jnp.sum(a, axis=1, keepdims=True)
    return a / jnp.maximum(deg, 1.0)


def _ref_propagate(adj_dict, rating_set, x_src, w_dict, dst_feat, w_agg, b_agg):
    feats = [dst_feat]
    for r in rating_set:
        w, b = w_dict[r]
        feats.append(adj_dict[r] @ (x_src @ w + b))
    cat = jnp.concatenate(feats, axis=1)
    y = cat @ w_agg + b_agg
    return jnp.where(y >= 0, y, LEAKY_SLOPE * y)


if __name__ == "__main__":
    rating_set = [1, 2, 3]
    n_items, n_users = 64, 48
    embedding_dim = 32
    user_feature_dim = 16
    item_feature_dim = 16

    n_src_items_b0 = 24   # source item nodes in block 0
    n_dst_users_b0 = 16   # destination user nodes in block 0 (= src users of block 1)
    n_dst_items_b1 = 8    # destination item nodes in block 1

    key = jax.random.PRNGKey(0)
    k_par, k_graph, k_feat = jax.random.split(key, 3)

    params = init_params(
        k_par, rating_set, n_items, embedding_dim, user_feature_dim, item_feature_dim
    )

    kg = jax.random.split(k_graph, 2 * len(rating_set) + 2)
    kf = jax.random.split(k_feat, 3)

    block0 = {
        "src_item_nids": jax.random.randint(kg[-1], (n_src_items_b0,), 0, n_items),
        "src_item_features": jax.random.normal(
            kf[0], (n_src_items_b0, item_feature_dim), jnp.float32),
        "dst_user_features": jax.random.normal(
            kf[1], (n_dst_users_b0, user_feature_dim), jnp.float32),
        # dst node IDs of a DGL block are unique -> draw a permutation (randint could
        # collide and shrink the nid -> index dict).
        "dst_user_nids": jax.random.permutation(kg[-2], n_users)[:n_dst_users_b0],
        "adj_rev": {r: _random_norm_adj(kg[i], n_dst_users_b0, n_src_items_b0)
                    for i, r in enumerate(rating_set)},
    }
    block0["adj_rev_prepared"] = prepare_adj_stack(
        block0["adj_rev"], rating_set, n_dst_users_b0, n_src_items_b0)

    block1 = {
        "dst_item_features": jax.random.normal(
            kf[2], (n_dst_items_b1, item_feature_dim), jnp.float32),
        "dst_item_nids": jnp.arange(n_dst_items_b1, dtype=jnp.int32),
        "adj": {r: _random_norm_adj(kg[len(rating_set) + i], n_dst_items_b1, n_dst_users_b0)
                for i, r in enumerate(rating_set)},
    }
    block1["adj_prepared"] = prepare_adj_stack(
        block1["adj"], rating_set, n_dst_items_b1, n_dst_users_b0)

    # dst_node_type == "user": uses only block 0
    user_emb, user_nid_to_idx = gcmc_encoder_forward(params, rating_set, [block0], "user")
    # dst_node_type == "item": reuse the already-computed user embeddings (no recompute)
    item_emb, item_nid_to_idx = gcmc_encoder_forward(
        params, rating_set, [block0, block1], "item", user_h=user_emb)

    jax.block_until_ready(user_emb)
    jax.block_until_ready(item_emb)

    assert user_emb.shape == (n_dst_users_b0, embedding_dim)
    assert item_emb.shape == (n_dst_items_b1, embedding_dim)
    assert len(user_nid_to_idx) == n_dst_users_b0
    assert len(item_nid_to_idx) == n_dst_items_b1

    # Pure-JAX f32 reference (bf16 MXU inputs -> loose tolerance)
    item_id_emb = jnp.take(params["item_id_embedding"], block0["src_item_nids"], axis=0)
    msg_in = jnp.concatenate([block0["src_item_features"], item_id_emb], axis=1)
    user_ref = _ref_propagate(block0["adj_rev"], rating_set, msg_in, params["W_rev"],
                              block0["dst_user_features"], *params["user_agg"])
    item_ref = _ref_propagate(block1["adj"], rating_set, user_ref, params["W"],
                              block1["dst_item_features"], *params["item_agg"])
    assert jnp.allclose(user_emb, user_ref, rtol=0.1, atol=0.15)
    assert jnp.allclose(item_emb, item_ref, rtol=0.1, atol=0.2)

    # TODO(synk): DGL's dynamic edge batching / heterograph bookkeeping has no Pallas
    # equivalent; graph structure is a dense row-normalized adjacency (exactly
    # equivalent to copy_e + mean aggregation).
    print("KERNEL_OK")
</pallas_src>

<mosaic_0001>
module attributes {stable_mosaic.version = 11 : i64} {
  func.func @_message_kernel(%arg0: i32, %arg1: i32, %arg2: memref<24x128xbf16, #tpu.memory_space<vmem>>, %arg3: memref<1x128x128xbf16, #tpu.memory_space<vmem>>, %arg4: memref<1x1x128xf32, #tpu.memory_space<vmem>>, %arg5: memref<1x24x128xbf16, #tpu.memory_space<vmem>>) attributes {dimension_semantics = [#tpu.dimension_semantics<parallel>, #tpu.dimension_semantics<parallel>], iteration_bounds = array<i64: 3, 1>, scalar_prefetch = 0 : i64, scratch_operands = 0 : i64, tpu.core_type = #tpu.core_type<tc>, window_params = [{transform_indices = @transform_0, window_bounds = array<i64: 24, 128>}, {transform_indices = @transform_1, window_bounds = array<i64: 1, 128, 128>}, {transform_indices = @transform_2, window_bounds = array<i64: 1, 1, 128>}, {transform_indices = @transform_3, window_bounds = array<i64: 1, 24, 128>}]} {
    %c0 = arith.constant 0 : index
    %c0_0 = arith.constant 0 : index
    %0 = vector.load %arg2[%c0, %c0_0] : memref<24x128xbf16, #tpu.memory_space<vmem>>, vector<24x128xbf16>
    %c0_1 = arith.constant 0 : index
    %c0_2 = arith.constant 0 : index
    %c0_3 = arith.constant 0 : index
    %1 = vector.load %arg3[%c0_1, %c0_2, %c0_3] : memref<1x128x128xbf16, #tpu.memory_space<vmem>>, vector<1x128x128xbf16>
    %2 = vector.shape_cast %1 : vector<1x128x128xbf16> to vector<128x128xbf16>
    %cst = arith.constant dense<0.000000e+00> : vector<24x128xf32>
    %3 = tpu.matmul %0, %2, %cst {dimension_numbers = #tpu.dot_dimension_numbers<[1], [0], [0], [1], [0, 0, 1, 1], [], []>} : vector<24x128xbf16>, vector<128x128xbf16>, vector<24x128xf32> -> vector<24x128xf32>
    %c0_4 = arith.constant 0 : index
    %c0_5 = arith.constant 0 : index
    %c0_6 = arith.constant 0 : index
    %4 = vector.load %arg4[%c0_4, %c0_5, %c0_6] : memref<1x1x128xf32, #tpu.memory_space<vmem>>, vector<1x1x128xf32>
    %5 = vector.shape_cast %4 : vector<1x1x128xf32> to vector<1x128xf32>
    %6 = vector.broadcast %5 : vector<1x128xf32> to vector<24x128xf32>
    %7 = arith.addf %3, %6 : vector<24x128xf32>
    %8 = arith.truncf %7 : vector<24x128xf32> to vector<24x128xbf16>
    %c0_7 = arith.constant 0 : index
    %c0_8 = arith.constant 0 : index
    %c0_9 = arith.constant 0 : index
    %9 = vector.load %arg5[%c0_7, %c0_8, %c0_9] : memref<1x24x128xbf16, #tpu.memory_space<vmem>>, vector<1x24x128xbf16>
    %10 = vector.shape_cast %9 : vector<1x24x128xbf16> to vector<24x128xbf16>
    %11 = vector.shape_cast %8 : vector<24x128xbf16> to vector<1x24x128xbf16>
    tpu.vector_store %arg5[%c0_7, %c0_8, %c0_9], %11 {strides = array<i32>} : memref<1x24x128xbf16, #tpu.memory_space<vmem>>, vector<1x24x128xbf16>,
    return
  }
  func.func @transform_0(%arg0: i32, %arg1: i32) -> (i32, i32) {
    %c0_i32 = arith.constant 0 : i32
    %c0_i32_0 = arith.constant 0 : i32
    return %arg1, %c0_i32 : i32, i32
  }
  func.func @transform_1(%arg0: i32, %arg1: i32) -> (i32, i32, i32) {
    %c0_i32 = arith.constant 0 : i32
    %c0_i32_0 = arith.constant 0 : i32
    %c0_i32_1 = arith.constant 0 : i32
    return %arg0, %c0_i32, %c0_i32_0 : i32, i32, i32
  }
  func.func @transform_2(%arg0: i32, %arg1: i32) -> (i32, i32, i32) {
    %c0_i32 = arith.constant 0 : i32
    %c0_i32_0 = arith.constant 0 : i32
    %c0_i32_1 = arith.constant 0 : i32
    return %arg0, %c0_i32, %c0_i32_0 : i32, i32, i32
  }
  func.func @transform_3(%arg0: i32, %arg1: i32) -> (i32, i32, i32) {
    %c0_i32 = arith.constant 0 : i32
    %c0_i32_0 = arith.constant 0 : i32
    return %arg0, %arg1, %c0_i32 : i32, i32, i32
  }
}

</mosaic_0001>

<bundles_post_ra>
// kernel: tpu_custom_call.1
= control target key start
LH: loop header
LB: loop body
LE: loop exit
PB: predicated region body
PF: predicated region fallthrough
CT: control target
= control target key end

     0   :  { %8 = vsyncpa [#allocation3], 0  ;;  %s1038_s0 = inlined_call_operand.hbm [shape: bf16[24,128], index: 0, kind: input, shape index: {}]   ;;  %s1039_s1 = inlined_call_operand.hbm [shape: bf16[3,128,128], index: 1, kind: input, shape index: {}]   ;;  %s1040_s2 = inlined_call_operand.hbm [shape: f32[3,1,128], index: 2, kind: input, shape index: {}]   ;;  %s1041_s3 = inlined_call_operand.hbm [shape: bf16[3,24,128], index: 3, kind: output, shape index: {}]  }
   0x1   :  { %9 = vsyncpa [#allocation6], 0 }
   0x2   :  { %11 = vsyncpa [#allocation6 + $0x1], 0 }
   0x3   :  { %12 = vsyncpa [#allocation4], 0 }
   0x4   :  { %14 = vsyncpa [#allocation4 + $0x1], 0  ;;  %s862_s12 = smov 0   ;;  %s864_s13 = smov 0  }
   0x5   :  { %s866_s14 = smov 0   ;;  %s868_s15 = smov 0  }
   0x6   :  { %s870_s16 = smov 0   ;;  %s872_s17 = smov 0  }
   0x7 LB: > { %s32_s18 = sadd.s32 1, %s831_s16  ;;  %s65_s19 = sadd.s32 1, %s823_s14  ;;  %s835_s17 = sphi %s872_s17, %s20_s17   ;;  %s831_s16 = sphi %s870_s16, %s1052_s16   ;;  %s827_s15 = sphi %s868_s15, %s1051_s15   ;;  %s823_s14 = sphi %s866_s14, %s1050_s14   ;;  %s819_s13 = sphi %s864_s13, %s1049_s13   ;;  %s815_s12 = sphi %s862_s12, %s1048_s12  }
   0x8   : > { %p34_p0 = scmp.ge.s32.totalorder %s32_s18, 3  ;;  %p72_p1 = scmp.ne.s32.totalorder %s823_s14, %s819_s13 }
   0x9   : > { %p73_p2 = scmp.eq.s32.totalorder %s835_s17, 0  ;;  %p602_p5 = scmp.lt.s32.totalorder %s835_s17, 3 }
   0xa   : > { %s1054_s18 = smov (%p34_p0, %s32_s18), 0  ;;  %s173_s22 = sand.u32 1, %s835_s17  }
   0xb   : > { %p902_p3 = por %p73_p2, %p72_p1  ;;  %s62_s21 = ssub.s32 %s831_s16, %s1054_s18 }
   0xc   : > { %p63_p4 = scmp.eq.s32.totalorder %s62_s21, 0  ;;  %s175_s23 = sand.u32 1, %s823_s14  }
   0xd   : > { %s506_s25 = sshll.u32 %s175_s23, 6  ;;  %s551_s26 = sshll.u32 %s831_s16, 6 }
   0xe   : > { %s912_s24 = scalar_select %p63_p4, %s823_s14, %s65_s19  }
   0xf   : > { %s182_s29 = scalar_lea.hbm %s1039_s1, %s551_s26  ;;  %s177_s30 = scalar_lea.vmem [#allocation5], %s506_s25 }
  0x10   : > { %s185_s4 = sshll.u32 %s177_s30, 4  ;;  %s183_s5 = sshll.u32 %s182_s29, 4  ;;  %s186_s4 = int_to_ptr.vmem [resolvable:$true] %s185_s4  ;;  %s184_s5 = int_to_ptr.hbm [resolvable:$true] %s183_s5 }
  0x11   : > { %p922_p6 = pnand %p602_p5, %p902_p3  ;;  %s926_s7 = scalar_lea.sflag [#allocation6], %s173_s22 }
  0x12   : > { %s837_s8 = smov 64   ;;  %s838_s9 = smov 4  }
  0x13   : > { %593 = dma.hbm_to_vmem [thread:$0]  (!%p922_p6), %s184_s5, 1024, %s186_s4, %s926_s7, %s837_s8, %s837_s8, %s838_s9  }
  0x14   : > { %s935_s10 = sadd.s32 4294967295, %s835_s17   ;;  %s502_s11 = sadd.s32 4294967294, %s835_s17  }
  0x15   : > { %p78_p7 = scmp.ne.s32.totalorder %s819_s13, %s815_s12  ;;  %p79_p8 = scmp.eq.s32.totalorder %s935_s10, 0 }
  0x16   : > { %p130_p9 = scmp.eq.s32.totalorder %s935_s10, 2  ;;  %p136_p10 = scmp.eq.s32.totalorder %s502_s11, 2 }
  0x17   : > { %p503_p11 = scmp.ge.s32.totalorder %s835_s17, 1  ;;  %p945_p12 = por %p79_p8, %p78_p7 }
  0x18   : > { %p952_p13 = por %p130_p9, %p72_p1  ;;  %p956_p0 = por %p136_p10, %p78_p7 }
  0x19   : > { %p143_p2 = scmp.lt.s32.totalorder %s835_s17, 4  ;;  %s157_s26 = sshll.u32 %s1038_s0, 4  ;;  %s158_s26 = int_to_ptr.hbm [resolvable:$true] %s157_s26 }
  0x1a   : > { %s839_s28 = smov [#allocation2]   ;;  %s201_s5 = scalar_lea.hbm %s1040_s2, %s831_s16 }
  0x1b   : > { %p964_p3 = pnand %p503_p11, %p143_p2  ;;  %s159_s29 = sshll.u32 %s839_s28, 4  ;;  %s160_s29 = int_to_ptr.vmem [resolvable:$true] %s159_s29 }
  0x1c   : > { %s203_s11 = sshll.u32 %s201_s5, 4  ;;  %s198_s22 = scalar_lea.vmem [#allocation7], %s175_s23  ;;  %s204_s11 = int_to_ptr.hbm [resolvable:$true] %s203_s11 }
  0x1d   : > { %p586_p1 = pneg %p964_p3  ;;  %s205_s25 = sshll.u32 %s198_s22, 4  ;;  %s206_s25 = int_to_ptr.vmem [resolvable:$true] %s205_s25 }
  0x1e   : > { %596 = dma.hbm_to_vmem [thread:$0]  (!%p922_p6), %s204_s11, 16, %s206_s25, %s926_s7  }
  0x1f   : > { %p587_p4 = pnand %p586_p1, %p79_p8  ;;  %214 = sbr.rel (%p964_p3) target bundleno = 215 (0xd7), region = 32 }
  0x21   : > { %589 = dma.hbm_to_vmem [thread:$0]  (!%p587_p4), %s158_s26, 192, %s160_s29, [#allocation3], %s837_s8, %s837_s8, %s838_s9  }
  0x24   : > { %802 = dma.done.wait (%p79_p8), [#allocation3], 192  }
  0x25   : > { %804 = vsyncadd (%p79_p8), [#allocation3], 4294967104  ;;  %s221_s23 = sand.u32 1, %s935_s10   ;;  %s992_s28 = sand.u32 1, %s819_s13  }
  0x26   : > { %s511_s30 = sshll.u32 %s992_s28, 6  ;;  %s222_s8 = scalar_lea.sflag [#allocation6], %s221_s23 }
  0x27   : > { %s225_s6 = scalar_lea.vmem [#allocation5], %s511_s30 }
  0x28   : > { %806 = dma.done.wait (%p945_p12), %s222_s8, 1040  }
  0x29   : > { %808 = vsyncadd (%p945_p12), %s222_s8, 4294966256  ;;  %v560_v0 = vld [vmem:[%s225_s6 + $0x38] sm:$0xff]  ;;  %v559_v1 = vld [vmem:[%s225_s6 + $0x30] sm:$0xff]  ;;  %s234_s7 = scalar_lea.vmem [#allocation7], %s992_s28  ;;  %s574_s9 = smul.u32 12, %s992_s28 }
  0x2a   : > { %345 = vmatpush.bf16.msra.mxu0 %v560_v0  ;;  %566 = vmatpush.bf16.msra.mxu1 %v560_v0  ;;  %v558_v2 = vld [vmem:[%s225_s6 + $0x28] sm:$0xff]  ;;  %v557_v3 = vld [vmem:[%s225_s6 + $0x20] sm:$0xff]  ;;  %v556_v4 = vld [vmem:[%s225_s6 + $0x18] sm:$0xff]  ;;  %s575_s10 = smul.u32 12, %s827_s15  ;;  %s370_s15 = scalar_lea.sflag [#allocation4], %s992_s28 }
  0x2b   : > { %v555_v5 = vld [vmem:[%s225_s6 + $0x10] sm:$0xff]  ;;  %v554_v6 = vld [vmem:[%s225_s6 + $0x8] sm:$0xff]  ;;  %v266_v7 = vld [vmem:[#allocation2 + $0x8] sm:$0xf]  ;;  %s261_s29 = scalar_lea.vmem [#allocation8], %s574_s9  ;;  %s769_s30 = scalar_lea.hbm %s1041_s3, 36 }
  0x2c   : > { %v292_v8 = vunpack.c.l.b16 %v266_v7  ;;  %v553_v9 = vld [vmem:[%s225_s6] sm:$0xff]  ;;  %v552_v10 = vld [vmem:[#allocation2] sm:$0xff]  ;;  %s383_s27 = scalar_lea.hbm %s1041_s3, %s575_s10  ;;  %s384_s4 = sshll.u32 %s261_s29, 4  ;;  %s385_s4 = int_to_ptr.vmem [resolvable:$true] %s384_s4 }
  0x2d   : > { %v658_v12 = vld [vmem:[%s234_s7] ss:$0 sm:$0xff]  ;;  %s386_s5 = sshll.u32 %s383_s27, 4  ;;  %s387_s5 = int_to_ptr.hbm [resolvable:$true] %s386_s5 }
  0x2e   : > { %346 = vmatpush.bf16.msra.mxu0 %v559_v1  ;;  %567 = vmatpush.bf16.msra.mxu1 %v559_v1  ;;  %v294_v11 = vpack.c.b16 %v292_v8, %v292_v8  ;;  %s763_s11 = sshra.s32 %s387_s5, 4  ;;  %s764_s11 = int_to_ptr.hbm [resolvable:$true] %s763_s11 }
  0x2f   : > { %s765_s22 = scalar_lea.hbm %s764_s11, 12  ;;  %p770_p8 = scmp.lt.s32.totalorder %s764_s11, %s1041_s3 }
  0x30   : > { %p766_p5 = scmp.ne.s32.totalorder %s764_s11, %s765_s22  ;;  %p771_p9 = scmp.lt.s32.totalorder %s769_s30, %s765_s22 }
  0x32   : > { %347 = vmatpush.bf16.msra.mxu0 %v558_v2  ;;  %568 = vmatpush.bf16.msra.mxu1 %v558_v2  ;;  %p767_p6 = pnand %p766_p5, %p952_p13  ;;  %p772_p10 = por %p771_p9, %p770_p8 }
  0x34   : > { %p768_p7 = pneg %p767_p6 }
  0x36   : > { %348 = vmatpush.bf16.msra.mxu0 %v557_v3  ;;  %569 = vmatpush.bf16.msra.mxu1 %v557_v3  ;;  %p773_p11 = pnand %p772_p10, %p768_p7 }
  0x3a   : > { %349 = vmatpush.bf16.msra.mxu0 %v556_v4  ;;  %570 = vmatpush.bf16.msra.mxu1 %v556_v4 }
  0x3e   : > { %350 = vmatpush.bf16.msra.mxu0 %v555_v5  ;;  %571 = vmatpush.bf16.msra.mxu1 %v555_v5 }
  0x42   : > { %351 = vmatpush.bf16.msra.mxu0 %v554_v6  ;;  %572 = vmatpush.bf16.msra.mxu1 %v554_v6 }
  0x46   : > { %352 = vmatpush.bf16.msra.mxu0 %v553_v9  ;;  %573 = vmatpush.bf16.msra.mxu1 %v553_v9 }
  0x49   : > { %353 = vmatmul.bf16.vlgmr.msra.gmra.mxu0 %v552_v10  ;;  %358 = vmatmul.bf16.vlgmr.msra.gmra.mxu1 %v294_v11 }
  0xc6   : > { %v354_v13 = vpop.f32.mrf.mxu0  ;;  %v359_v14 = vpop.f32.mrf.mxu1 }
  0xc7   : > { %v360_v15 = vadd.f32 %v658_v12, %v359_v14  ;;  %v355_v19 = vadd.f32 %v658_v12, %v354_v13 }
  0xc9   : > { %v365_v16 = vpack.c.bf16 %v360_v15, %v360_v15 }
  0xcb   : > { %368 = vst [vmem:[%s261_s29 + $0x8] sm:$0xf] %v365_v16 }
  0xce   : > { %v356_v17 = vpop.f32.mrf.mxu0  ;;  %v361_v18 = vpop.f32.mrf.mxu1 }
  0xcf   : > { %v357_v20 = vadd.f32 %v658_v12, %v356_v17 }
  0xd1   : > { %v564_v21 = vpack.c.bf16 %v357_v20, %v355_v19 }
  0xd3   : > { %565 = vst [vmem:[%s261_s29] sm:$0xff] %v564_v21  }
  0xd4   : > { %776 = shalt.err (!%p773_p11)
}
  0xd5   : > { %s840_s28 = smov 64   ;;  %s841_s7 = smov 4  }
  0xd6   : > { %584 = dma.vmem_to_hbm [thread:$0]  (%p952_p13), %s385_s4, 192, %s387_s5, %s370_s15, %s840_s28, %s840_s28, %s841_s7  }
  0xd7 PF: > { %p604_p12 = scmp.ge.s32.totalorder %s835_s17, 2  ;;  %s401_s9 = sand.u32 1, %s815_s12  }
  0xd8   : > { %s402_s10 = scalar_lea.sflag [#allocation4], %s401_s9 }
  0xd9   : > { %p598_p2 = pnand %p604_p12, %p956_p0 }
  0xdb   : > { %p599_p3 = pneg %p598_p2 }
  0xdd   : > { %810 = dma.done.wait (%p599_p3), %s402_s10, 192  }
  0xde   : > { %812 = vsyncadd (%p599_p3), %s402_s10, 4294967104  ;;  %s20_s17 = sadd.s32 1, %s835_s17   ;;  %s1048_s12 = smov %s819_s13 }
  0xdf   : > { %p17_p1 = scmp.ge.s32.totalorder %s20_s17, 5   ;;  %s1049_s13 = smov %s823_s14 }
  0xe0   : > { %s1050_s14 = smov %s912_s24  ;;  %s1051_s15 = smov %s831_s16 }
  0xe1   : > { %s1052_s16 = smov %s1054_s18  ;;  %19 = sbr.rel (!%p17_p1) target bundleno = 7 (0x7), region = 94 }
  0xe6   :  { %408 = vsyncpa [#allocation3], 1 }
  0xe7   :  { %410 = vsyncpa [#allocation3 + $0x1], 1 }
  0xe8   :  { %411 = vsyncpa [#allocation6], 1 }
  0xe9   :  { %413 = vsyncpa [#allocation6 + $0x1], 1 }
  0xea   :  { %414 = vsyncpa [#allocation4], 1 }
  0xeb   :  { %416 = vsyncpa [#allocation4 + $0x1], 1 }

</bundles_post_ra>
